<compile_context>
chip_gen: v7x
topology: tpu7x:2x2x1
jax: 0.10.0
libtpu: 0.0.40
codegen_flags: <defaults>
</compile_context>

<pallas_src>
import functools
import math

import jax
import jax.numpy as jnp
from jax.experimental import pallas as pl
from jax.experimental.pallas import tpu as pltpu


def _layernorm(v, w, b, eps):
    mu = jnp.mean(v, axis=-1, keepdims=True)
    var = jnp.mean((v - mu) ** 2, axis=-1, keepdims=True)
    return (v - mu) * jax.lax.rsqrt(var + eps) * w + b


def mqt_block_kernel(x_ref,
                     wqkv_ref, bqkv_ref, wo_ref,
                     fc1w_ref, fc1b_ref, fc2w_ref,
                     vec_ref,
                     o_ref,
                     *, nhead, d_model, block_b, seq_len, mxu_dtype):
    D = d_model
    dh = D // nhead
    Bt, S = block_b, seq_len
    mx = lambda t: t.astype(mxu_dtype)          # MXU operand dtype (fp32 default)

    # rows are (batch, seq) flattened in the wrapper: row = b*S + s
    x2d = x_ref[...].astype(jnp.float32)                                 # (Bt*S, D)

    # packed bias / LayerNorm vectors: rows = bo, fc2b, n1w, n1b, glnw, glnb, n2w, n2b
    vec = vec_ref[...]
    bo, fc2b = vec[0:1, :], vec[1:2, :]
    n1w, n1b = vec[2:3, :], vec[3:4, :]
    glnw, glnb = vec[4:5, :], vec[5:6, :]
    n2w, n2b = vec[6:7, :], vec[7:8, :]

    # --- fused QKV projection (Q columns pre-scaled by 1/sqrt(dh) in wrapper) --
    qkv = jnp.dot(mx(x2d), wqkv_ref[...],
                  preferred_element_type=jnp.float32) + bqkv_ref[...]    # (Bt*S, 3D)
    q, k, v = qkv[:, :D], qkv[:, D:2 * D], qkv[:, 2 * D:]

    # --- head-batched self attention ------------------------------------------
    def split_heads(t):   # (Bt*S, D) -> (nhead*Bt, S, dh); leading index = h*Bt + b
        cols = jnp.concatenate([t[:, h * dh:(h + 1) * dh] for h in range(nhead)],
                               axis=0)                                    # (nhead*Bt*S, dh)
        return cols.reshape(nhead * Bt, S, dh)

    qh, kh, vh = split_heads(q), split_heads(k), split_heads(v)
    s = jnp.einsum('bqd,bkd->bqk', mx(qh), mx(kh),
                   preferred_element_type=jnp.float32)                    # (nhead*Bt, S, S)
    s = s - jnp.max(s, axis=-1, keepdims=True)
    e = jnp.exp(s)
    p = e * pl.reciprocal(jnp.sum(e, axis=-1, keepdims=True), approx=True)
    ctx = jnp.einsum('bqk,bkd->bqd', mx(p), mx(vh),
                     preferred_element_type=jnp.float32)                  # (nhead*Bt, S, dh)

    flat = ctx.reshape(nhead, Bt * S, dh)
    heads = jnp.concatenate([flat[h] for h in range(nhead)], axis=-1)     # (Bt*S, D)

    # --- single full-width output projection, residual + norm1 ---------------
    attn = jnp.dot(mx(heads), wo_ref[...], preferred_element_type=jnp.float32) + bo
    x1 = _layernorm(x2d + attn, n1w, n1b, 1e-5)      # dropout1 = identity (eval)

    # --- GLU block -------------------------------------------------------------
    hproj = jnp.dot(mx(x1), fc1w_ref[...],
                    preferred_element_type=jnp.float32) + fc1b_ref[...]   # (Bt*S, 2D)
    gated = hproj[:, :D] * jax.nn.sigmoid(hproj[:, D:])
    g2 = jnp.dot(mx(gated), fc2w_ref[...], preferred_element_type=jnp.float32) + fc2b
    glu_out = _layernorm(g2 + x1, glnw, glnb, 1e-12)  # GLU LayerNorm eps=1e-12

    # --- residual + norm2 (dropout2 = identity in eval) ------------------------
    x2 = _layernorm(x1 + glu_out, n2w, n2b, 1e-5)
    o_ref[...] = x2.astype(o_ref.dtype)               # (Bt*S, D), no reshape needed


def _pick_block_b(B, S, nhead, target_rows=256, score_budget_bytes=8 << 20):
    """Pick batch rows per grid step: fill MXU M-dim but keep grid>=2 (v7x TCs)."""
    divs = [d for d in range(1, B + 1) if B % d == 0]
    # keep grid_b >= 2 when B >= 2 so the "parallel" axis can shard across 2 TCs
    cands = [d for d in divs if d <= max(1, B // 2)] or divs
    # keep the fp32 (nhead*Bt, S, S) score tensor inside a VMEM budget
    fits = [d for d in cands if nhead * d * S * S * 4 <= score_budget_bytes]
    cands = fits or [cands[0]]
    for d in cands:                       # smallest block reaching the MXU row target
        if d * S >= target_rows:
            return d
    return cands[-1]                      # otherwise the largest allowed


def multi_query_transformer_block(x, params, *, nhead, block_b=None,
                                  mxu_dtype=jnp.float32):
    B, S, D = x.shape
    dh = D // nhead
    if block_b is None:
        block_b = _pick_block_b(B, S, nhead)
    if (block_b * S) % 8 != 0:
        block_b = B                       # full-extent block is always layout-legal
    assert B % block_b == 0
    grid_b = B // block_b
    rows = block_b * S

    # ---- parameter consolidation (layout plumbing, done once per call) ------
    scale = 1.0 / math.sqrt(dh)           # fold 1/sqrt(dh) into Q weight + bias
    wqkv = jnp.concatenate([params["wq"] * scale, params["wk"], params["wv"]],
                           axis=1)                                        # (D, 3D)
    bqkv = jnp.concatenate([params["bq"] * scale, params["bk"], params["bv"]],
                           axis=1)                                        # (1, 3D)
    vec = jnp.concatenate([params["bo"], params["fc2b"],
                           params["n1w"], params["n1b"],
                           params["glnw"], params["glnb"],
                           params["n2w"], params["n2b"]], axis=0)         # (8, D)
    wo, fc1w, fc2w = params["wo"], params["fc1w"], params["fc2w"]
    if jnp.dtype(mxu_dtype) != jnp.dtype(jnp.float32):
        # pre-cast weight slabs once in the wrapper (halves their DMA + VMEM)
        wqkv, wo, fc1w, fc2w = (w.astype(mxu_dtype) for w in (wqkv, wo, fc1w, fc2w))
    plist = [wqkv, bqkv, wo, fc1w, params["fc1b"], fc2w, vec]

    def const_spec(p):
        nd = p.ndim
        return pl.BlockSpec(p.shape, lambda i, _nd=nd: (0,) * _nd)

    kernel = functools.partial(mqt_block_kernel, nhead=nhead, d_model=D,
                               block_b=block_b, seq_len=S, mxu_dtype=mxu_dtype)

    x_rows = x.reshape(B * S, D)          # free wrapper-side flatten
    out = pl.pallas_call(
        kernel,
        out_shape=jax.ShapeDtypeStruct((B * S, D), x.dtype),
        grid=(grid_b,),
        in_specs=[pl.BlockSpec((rows, D), lambda i: (i, 0))]
                 + [const_spec(p) for p in plist],
        out_specs=pl.BlockSpec((rows, D), lambda i: (i, 0)),
        compiler_params=pltpu.CompilerParams(
            dimension_semantics=("parallel",),          # batch blocks independent
            vmem_limit_bytes=32 * 1024 * 1024),
    )(x_rows, *plist)
    return out.reshape(B, S, D)


def init_params(key, d_model):
    D = d_model
    keys = jax.random.split(key, 8)
    scale = 0.05
    # nn.Linear weights are (out, in); store pre-transposed to (in, out).
    in_proj_w = jax.random.normal(keys[0], (3 * D, D), jnp.float32) * scale
    in_proj_b = jax.random.normal(keys[1], (3 * D,), jnp.float32) * scale
    wq, wk, wv = in_proj_w[:D].T, in_proj_w[D:2 * D].T, in_proj_w[2 * D:].T
    bq, bk, bv = (in_proj_b[:D].reshape(1, D),
                  in_proj_b[D:2 * D].reshape(1, D),
                  in_proj_b[2 * D:].reshape(1, D))
    wo = (jax.random.normal(keys[2], (D, D), jnp.float32) * scale).T
    bo = (jax.random.normal(keys[3], (D,), jnp.float32) * scale).reshape(1, D)
    fc1w = (jax.random.normal(keys[4], (2 * D, D), jnp.float32) * scale).T
    fc1b = (jax.random.normal(keys[5], (2 * D,), jnp.float32) * scale).reshape(1, 2 * D)
    fc2w = (jax.random.normal(keys[6], (D, D), jnp.float32) * scale).T
    fc2b = (jax.random.normal(keys[7], (D,), jnp.float32) * scale).reshape(1, D)
    ones = jnp.ones((1, D), jnp.float32)
    zeros = jnp.zeros((1, D), jnp.float32)
    return dict(wq=wq, wk=wk, wv=wv, bq=bq, bk=bk, bv=bv, wo=wo, bo=bo,
                n1w=ones, n1b=zeros,
                fc1w=fc1w, fc1b=fc1b, fc2w=fc2w, fc2b=fc2b,
                glnw=ones, glnb=zeros,
                n2w=ones, n2b=zeros)


def ref_forward(x, p, nhead):
    """Plain-JAX reference mirroring the PyTorch forward (eval mode)."""
    B, S, D = x.shape
    dh = D // nhead

    def ln(v, w, b, eps):
        mu = v.mean(-1, keepdims=True)
        var = ((v - mu) ** 2).mean(-1, keepdims=True)
        return (v - mu) / jnp.sqrt(var + eps) * w + b

    q = (x @ p["wq"] + p["bq"]).reshape(B, S, nhead, dh).transpose(0, 2, 1, 3)
    k = (x @ p["wk"] + p["bk"]).reshape(B, S, nhead, dh).transpose(0, 2, 1, 3)
    v = (x @ p["wv"] + p["bv"]).reshape(B, S, nhead, dh).transpose(0, 2, 1, 3)
    s = (q / math.sqrt(dh)) @ k.transpose(0, 1, 3, 2)
    a = jax.nn.softmax(s, axis=-1)
    heads = (a @ v).transpose(0, 2, 1, 3).reshape(B, S, D)
    attn = heads @ p["wo"] + p["bo"]
    x1 = ln(x + attn, p["n1w"], p["n1b"], 1e-5)
    h = x1 @ p["fc1w"] + p["fc1b"]
    gated = h[..., :D] * jax.nn.sigmoid(h[..., D:])
    g2 = gated @ p["fc2w"] + p["fc2b"]
    glu = ln(g2 + x1, p["glnw"], p["glnb"], 1e-12)
    return ln(x1 + glu, p["n2w"], p["n2b"], 1e-5)


if __name__ == "__main__":
    B, S, D, NHEAD = 2, 8, 32, 4
    key = jax.random.PRNGKey(0)
    kx, kp = jax.random.split(key)
    x = jax.random.normal(kx, (B, S, D), jnp.float32)
    params = init_params(kp, D)

    out = multi_query_transformer_block(x, params, nhead=NHEAD)
    out = jax.block_until_ready(out)

    ref = ref_forward(x, params, NHEAD)
    assert out.shape == (B, S, D)
    err = float(jnp.max(jnp.abs(out - ref)))
    # Tolerance 2e-3: softmax denominator uses the EUP approximate reciprocal
    # (pl.reciprocal(approx=True)); all other math is fp32 on the default path.
    assert jnp.allclose(out, ref, atol=2e-3, rtol=2e-3), \
        f"mismatch vs reference (max abs err {err})"
    print("KERNEL_OK")
</pallas_src>

<mosaic_0001>
module attributes {stable_mosaic.version = 11 : i64} {
  func.func @mqt_block_kernel(%arg0: i32, %arg1: memref<8x32xf32, #tpu.memory_space<vmem>>, %arg2: memref<32x96xf32, #tpu.memory_space<vmem>>, %arg3: memref<1x96xf32, #tpu.memory_space<vmem>>, %arg4: memref<32x32xf32, #tpu.memory_space<vmem>>, %arg5: memref<32x64xf32, #tpu.memory_space<vmem>>, %arg6: memref<1x64xf32, #tpu.memory_space<vmem>>, %arg7: memref<32x32xf32, #tpu.memory_space<vmem>>, %arg8: memref<8x32xf32, #tpu.memory_space<vmem>>, %arg9: memref<8x32xf32, #tpu.memory_space<vmem>>) attributes {dimension_semantics = [#tpu.dimension_semantics<parallel>], iteration_bounds = array<i64: 2>, scalar_prefetch = 0 : i64, scratch_operands = 0 : i64, tpu.core_type = #tpu.core_type<tc>, window_params = [{transform_indices = @transform_0, window_bounds = array<i64: 8, 32>}, {pipeline_mode = #tpu.pipeline_mode<synchronous>, transform_indices = @transform_1, window_bounds = array<i64: 32, 96>}, {pipeline_mode = #tpu.pipeline_mode<synchronous>, transform_indices = @transform_2, window_bounds = array<i64: 1, 96>}, {pipeline_mode = #tpu.pipeline_mode<synchronous>, transform_indices = @transform_3, window_bounds = array<i64: 32, 32>}, {pipeline_mode = #tpu.pipeline_mode<synchronous>, transform_indices = @transform_4, window_bounds = array<i64: 32, 64>}, {pipeline_mode = #tpu.pipeline_mode<synchronous>, transform_indices = @transform_5, window_bounds = array<i64: 1, 64>}, {pipeline_mode = #tpu.pipeline_mode<synchronous>, transform_indices = @transform_6, window_bounds = array<i64: 32, 32>}, {pipeline_mode = #tpu.pipeline_mode<synchronous>, transform_indices = @transform_7, window_bounds = array<i64: 8, 32>}, {transform_indices = @transform_8, window_bounds = array<i64: 8, 32>}]} {
    %c0 = arith.constant 0 : index
    %c0_0 = arith.constant 0 : index
    %0 = vector.load %arg1[%c0, %c0_0] : memref<8x32xf32, #tpu.memory_space<vmem>>, vector<8x32xf32>
    %c0_1 = arith.constant 0 : index
    %c0_2 = arith.constant 0 : index
    %1 = vector.load %arg8[%c0_1, %c0_2] : memref<8x32xf32, #tpu.memory_space<vmem>>, vector<8x32xf32>
    %2 = vector.extract_strided_slice %1 {offsets = [0, 0], sizes = [1, 32], strides = [1, 1]} : vector<8x32xf32> to vector<1x32xf32>
    %3 = vector.extract_strided_slice %1 {offsets = [1, 0], sizes = [1, 32], strides = [1, 1]} : vector<8x32xf32> to vector<1x32xf32>
    %4 = vector.extract_strided_slice %1 {offsets = [2, 0], sizes = [1, 32], strides = [1, 1]} : vector<8x32xf32> to vector<1x32xf32>
    %5 = vector.extract_strided_slice %1 {offsets = [3, 0], sizes = [1, 32], strides = [1, 1]} : vector<8x32xf32> to vector<1x32xf32>
    %6 = vector.extract_strided_slice %1 {offsets = [4, 0], sizes = [1, 32], strides = [1, 1]} : vector<8x32xf32> to vector<1x32xf32>
    %7 = vector.extract_strided_slice %1 {offsets = [5, 0], sizes = [1, 32], strides = [1, 1]} : vector<8x32xf32> to vector<1x32xf32>
    %8 = vector.extract_strided_slice %1 {offsets = [6, 0], sizes = [1, 32], strides = [1, 1]} : vector<8x32xf32> to vector<1x32xf32>
    %9 = vector.extract_strided_slice %1 {offsets = [7, 0], sizes = [1, 32], strides = [1, 1]} : vector<8x32xf32> to vector<1x32xf32>
    %c0_3 = arith.constant 0 : index
    %c0_4 = arith.constant 0 : index
    %10 = vector.load %arg2[%c0_3, %c0_4] : memref<32x96xf32, #tpu.memory_space<vmem>>, vector<32x96xf32>
    %cst = arith.constant dense<0.000000e+00> : vector<8x96xf32>
    %11 = tpu.matmul %0, %10, %cst {dimension_numbers = #tpu.dot_dimension_numbers<[1], [0], [0], [1], [0, 0, 1, 1], [], []>} : vector<8x32xf32>, vector<32x96xf32>, vector<8x96xf32> -> vector<8x96xf32>
    %c0_5 = arith.constant 0 : index
    %c0_6 = arith.constant 0 : index
    %12 = vector.load %arg3[%c0_5, %c0_6] : memref<1x96xf32, #tpu.memory_space<vmem>>, vector<1x96xf32>
    %13 = vector.broadcast %12 : vector<1x96xf32> to vector<8x96xf32>
    %14 = arith.addf %11, %13 : vector<8x96xf32>
    %15 = vector.extract_strided_slice %14 {offsets = [0, 0], sizes = [8, 32], strides = [1, 1]} : vector<8x96xf32> to vector<8x32xf32>
    %16 = vector.extract_strided_slice %14 {offsets = [0, 32], sizes = [8, 32], strides = [1, 1]} : vector<8x96xf32> to vector<8x32xf32>
    %17 = vector.extract_strided_slice %14 {offsets = [0, 64], sizes = [8, 32], strides = [1, 1]} : vector<8x96xf32> to vector<8x32xf32>
    %18 = vector.extract_strided_slice %15 {offsets = [0, 0], sizes = [8, 8], strides = [1, 1]} : vector<8x32xf32> to vector<8x8xf32>
    %19 = vector.extract_strided_slice %15 {offsets = [0, 8], sizes = [8, 8], strides = [1, 1]} : vector<8x32xf32> to vector<8x8xf32>
    %20 = vector.extract_strided_slice %15 {offsets = [0, 16], sizes = [8, 8], strides = [1, 1]} : vector<8x32xf32> to vector<8x8xf32>
    %21 = vector.extract_strided_slice %15 {offsets = [0, 24], sizes = [8, 8], strides = [1, 1]} : vector<8x32xf32> to vector<8x8xf32>
    %22 = tpu.concatenate %18, %19, %20, %21 in 0 : vector<8x8xf32>, vector<8x8xf32>, vector<8x8xf32>, vector<8x8xf32> -> vector<32x8xf32>
    %23 = vector.shape_cast %22 : vector<32x8xf32> to vector<4x8x8xf32>
    %24 = vector.extract_strided_slice %16 {offsets = [0, 0], sizes = [8, 8], strides = [1, 1]} : vector<8x32xf32> to vector<8x8xf32>
    %25 = vector.extract_strided_slice %16 {offsets = [0, 8], sizes = [8, 8], strides = [1, 1]} : vector<8x32xf32> to vector<8x8xf32>
    %26 = vector.extract_strided_slice %16 {offsets = [0, 16], sizes = [8, 8], strides = [1, 1]} : vector<8x32xf32> to vector<8x8xf32>
    %27 = vector.extract_strided_slice %16 {offsets = [0, 24], sizes = [8, 8], strides = [1, 1]} : vector<8x32xf32> to vector<8x8xf32>
    %28 = tpu.concatenate %24, %25, %26, %27 in 0 : vector<8x8xf32>, vector<8x8xf32>, vector<8x8xf32>, vector<8x8xf32> -> vector<32x8xf32>
    %29 = vector.shape_cast %28 : vector<32x8xf32> to vector<4x8x8xf32>
    %30 = vector.extract_strided_slice %17 {offsets = [0, 0], sizes = [8, 8], strides = [1, 1]} : vector<8x32xf32> to vector<8x8xf32>
    %31 = vector.extract_strided_slice %17 {offsets = [0, 8], sizes = [8, 8], strides = [1, 1]} : vector<8x32xf32> to vector<8x8xf32>
    %32 = vector.extract_strided_slice %17 {offsets = [0, 16], sizes = [8, 8], strides = [1, 1]} : vector<8x32xf32> to vector<8x8xf32>
    %33 = vector.extract_strided_slice %17 {offsets = [0, 24], sizes = [8, 8], strides = [1, 1]} : vector<8x32xf32> to vector<8x8xf32>
    %34 = tpu.concatenate %30, %31, %32, %33 in 0 : vector<8x8xf32>, vector<8x8xf32>, vector<8x8xf32>, vector<8x8xf32> -> vector<32x8xf32>
    %35 = vector.shape_cast %34 : vector<32x8xf32> to vector<4x8x8xf32>
    "tpu.trace_start"() <{level = 10 : i32, message = "bqd,bkd->bqk"}> : () -> ()
    %cst_7 = arith.constant dense<0.000000e+00> : vector<4x8x8xf32>
    %36 = tpu.matmul %23, %29, %cst_7 {dimension_numbers = #tpu.dot_dimension_numbers<[2], [2], [1], [1], [0, 0, 0, 1, 1, 1], [0], [0]>} : vector<4x8x8xf32>, vector<4x8x8xf32>, vector<4x8x8xf32> -> vector<4x8x8xf32>
    "tpu.trace_stop"() : () -> ()
    %cst_8 = arith.constant dense<0xFF800000> : vector<4x8xf32>
    %37 = vector.multi_reduction <maximumf>, %36, %cst_8 [2] : vector<4x8x8xf32> to vector<4x8xf32>
    %38 = vector.shape_cast %37 : vector<4x8xf32> to vector<4x8x1xf32>
    %39 = vector.broadcast %38 : vector<4x8x1xf32> to vector<4x8x8xf32>
    %40 = arith.subf %36, %39 : vector<4x8x8xf32>
    %41 = math.exp %40 : vector<4x8x8xf32>
    %cst_9 = arith.constant dense<0.000000e+00> : vector<4x8xf32>
    %42 = vector.multi_reduction <add>, %41, %cst_9 [2] : vector<4x8x8xf32> to vector<4x8xf32>
    %43 = vector.shape_cast %42 : vector<4x8xf32> to vector<4x8x1xf32>
    %44 = tpu.reciprocal %43 {approx = true} : vector<4x8x1xf32> -> vector<4x8x1xf32>
    %45 = vector.broadcast %44 : vector<4x8x1xf32> to vector<4x8x8xf32>
    %46 = arith.mulf %41, %45 : vector<4x8x8xf32>
    "tpu.trace_start"() <{level = 10 : i32, message = "bqk,bkd->bqd"}> : () -> ()
    %cst_10 = arith.constant dense<0.000000e+00> : vector<4x8x8xf32>
    %47 = tpu.matmul %46, %35, %cst_10 {dimension_numbers = #tpu.dot_dimension_numbers<[2], [1], [1], [2], [0, 0, 0, 1, 1, 2], [0], [0]>} : vector<4x8x8xf32>, vector<4x8x8xf32>, vector<4x8x8xf32> -> vector<4x8x8xf32>
    "tpu.trace_stop"() : () -> ()
    %48 = vector.extract_strided_slice %47 {offsets = [0, 0, 0], sizes = [1, 8, 8], strides = [1, 1, 1]} : vector<4x8x8xf32> to vector<1x8x8xf32>
    %49 = vector.shape_cast %48 : vector<1x8x8xf32> to vector<8x8xf32>
    %50 = vector.extract_strided_slice %47 {offsets = [1, 0, 0], sizes = [1, 8, 8], strides = [1, 1, 1]} : vector<4x8x8xf32> to vector<1x8x8xf32>
    %51 = vector.shape_cast %50 : vector<1x8x8xf32> to vector<8x8xf32>
    %52 = vector.extract_strided_slice %47 {offsets = [2, 0, 0], sizes = [1, 8, 8], strides = [1, 1, 1]} : vector<4x8x8xf32> to vector<1x8x8xf32>
    %53 = vector.shape_cast %52 : vector<1x8x8xf32> to vector<8x8xf32>
    %54 = vector.extract_strided_slice %47 {offsets = [3, 0, 0], sizes = [1, 8, 8], strides = [1, 1, 1]} : vector<4x8x8xf32> to vector<1x8x8xf32>
    %55 = vector.shape_cast %54 : vector<1x8x8xf32> to vector<8x8xf32>
    %56 = tpu.concatenate %49, %51, %53, %55 in 1 : vector<8x8xf32>, vector<8x8xf32>, vector<8x8xf32>, vector<8x8xf32> -> vector<8x32xf32>
    %c0_11 = arith.constant 0 : index
    %c0_12 = arith.constant 0 : index
    %57 = vector.load %arg4[%c0_11, %c0_12] : memref<32x32xf32, #tpu.memory_space<vmem>>, vector<32x32xf32>
    %cst_13 = arith.constant dense<0.000000e+00> : vector<8x32xf32>
    %58 = tpu.matmul %56, %57, %cst_13 {dimension_numbers = #tpu.dot_dimension_numbers<[1], [0], [0], [1], [0, 0, 1, 1], [], []>} : vector<8x32xf32>, vector<32x32xf32>, vector<8x32xf32> -> vector<8x32xf32>
    %59 = vector.broadcast %2 : vector<1x32xf32> to vector<8x32xf32>
    %60 = arith.addf %58, %59 : vector<8x32xf32>
    %61 = arith.addf %0, %60 : vector<8x32xf32>
    %cst_14 = arith.constant dense<0.000000e+00> : vector<8xf32>
    %62 = vector.multi_reduction <add>, %61, %cst_14 [1] : vector<8x32xf32> to vector<8xf32>
    %63 = vector.shape_cast %62 : vector<8xf32> to vector<8x1xf32>
    %cst_15 = arith.constant 3.200000e+01 : f32
    %64 = vector.broadcast %cst_15 : f32 to vector<8x1xf32>
    %65 = arith.divf %63, %64 : vector<8x1xf32>
    %66 = vector.broadcast %65 : vector<8x1xf32> to vector<8x32xf32>
    %67 = arith.subf %61, %66 : vector<8x32xf32>
    %68 = arith.mulf %67, %67 : vector<8x32xf32>
    %cst_16 = arith.constant dense<0.000000e+00> : vector<8xf32>
    %69 = vector.multi_reduction <add>, %68, %cst_16 [1] : vector<8x32xf32> to vector<8xf32>
    %70 = vector.shape_cast %69 : vector<8xf32> to vector<8x1xf32>
    %cst_17 = arith.constant 3.200000e+01 : f32
    %71 = vector.broadcast %cst_17 : f32 to vector<8x1xf32>
    %72 = arith.divf %70, %71 : vector<8x1xf32>
    %73 = vector.broadcast %65 : vector<8x1xf32> to vector<8x32xf32>
    %74 = arith.subf %61, %73 : vector<8x32xf32>
    %cst_18 = arith.constant 9.99999974E-6 : f32
    %75 = vector.broadcast %cst_18 : f32 to vector<8x1xf32>
    %76 = arith.addf %72, %75 : vector<8x1xf32>
    %77 = math.rsqrt %76 : vector<8x1xf32>
    %78 = vector.broadcast %77 : vector<8x1xf32> to vector<8x32xf32>
    %79 = arith.mulf %74, %78 : vector<8x32xf32>
    %80 = vector.broadcast %4 : vector<1x32xf32> to vector<8x32xf32>
    %81 = arith.mulf %79, %80 : vector<8x32xf32>
    %82 = vector.broadcast %5 : vector<1x32xf32> to vector<8x32xf32>
    %83 = arith.addf %81, %82 : vector<8x32xf32>
    %c0_19 = arith.constant 0 : index
    %c0_20 = arith.constant 0 : index
    %84 = vector.load %arg5[%c0_19, %c0_20] : memref<32x64xf32, #tpu.memory_space<vmem>>, vector<32x64xf32>
    %cst_21 = arith.constant dense<0.000000e+00> : vector<8x64xf32>
    %85 = tpu.matmul %83, %84, %cst_21 {dimension_numbers = #tpu.dot_dimension_numbers<[1], [0], [0], [1], [0, 0, 1, 1], [], []>} : vector<8x32xf32>, vector<32x64xf32>, vector<8x64xf32> -> vector<8x64xf32>
    %c0_22 = arith.constant 0 : index
    %c0_23 = arith.constant 0 : index
    %86 = vector.load %arg6[%c0_22, %c0_23] : memref<1x64xf32, #tpu.memory_space<vmem>>, vector<1x64xf32>
    %87 = vector.broadcast %86 : vector<1x64xf32> to vector<8x64xf32>
    %88 = arith.addf %85, %87 : vector<8x64xf32>
    %89 = vector.extract_strided_slice %88 {offsets = [0, 0], sizes = [8, 32], strides = [1, 1]} : vector<8x64xf32> to vector<8x32xf32>
    %90 = vector.extract_strided_slice %88 {offsets = [0, 32], sizes = [8, 32], strides = [1, 1]} : vector<8x64xf32> to vector<8x32xf32>
    %91 = arith.negf %90 : vector<8x32xf32>
    %92 = math.exp %91 : vector<8x32xf32>
    %cst_24 = arith.constant 1.000000e+00 : f32
    %93 = vector.broadcast %cst_24 : f32 to vector<8x32xf32>
    %94 = arith.addf %93, %92 : vector<8x32xf32>
    %95 = arith.divf %93, %94 : vector<8x32xf32>
    %96 = arith.mulf %89, %95 : vector<8x32xf32>
    %c0_25 = arith.constant 0 : index
    %c0_26 = arith.constant 0 : index
    %97 = vector.load %arg7[%c0_25, %c0_26] : memref<32x32xf32, #tpu.memory_space<vmem>>, vector<32x32xf32>
    %cst_27 = arith.constant dense<0.000000e+00> : vector<8x32xf32>
    %98 = tpu.matmul %96, %97, %cst_27 {dimension_numbers = #tpu.dot_dimension_numbers<[1], [0], [0], [1], [0, 0, 1, 1], [], []>} : vector<8x32xf32>, vector<32x32xf32>, vector<8x32xf32> -> vector<8x32xf32>
    %99 = vector.broadcast %3 : vector<1x32xf32> to vector<8x32xf32>
    %100 = arith.addf %98, %99 : vector<8x32xf32>
    %101 = arith.addf %100, %83 : vector<8x32xf32>
    %cst_28 = arith.constant dense<0.000000e+00> : vector<8xf32>
    %102 = vector.multi_reduction <add>, %101, %cst_28 [1] : vector<8x32xf32> to vector<8xf32>
    %103 = vector.shape_cast %102 : vector<8xf32> to vector<8x1xf32>
    %cst_29 = arith.constant 3.200000e+01 : f32
    %104 = vector.broadcast %cst_29 : f32 to vector<8x1xf32>
    %105 = arith.divf %103, %104 : vector<8x1xf32>
    %106 = vector.broadcast %105 : vector<8x1xf32> to vector<8x32xf32>
    %107 = arith.subf %101, %106 : vector<8x32xf32>
    %108 = arith.mulf %107, %107 : vector<8x32xf32>
    %cst_30 = arith.constant dense<0.000000e+00> : vector<8xf32>
    %109 = vector.multi_reduction <add>, %108, %cst_30 [1] : vector<8x32xf32> to vector<8xf32>
    %110 = vector.shape_cast %109 : vector<8xf32> to vector<8x1xf32>
    %cst_31 = arith.constant 3.200000e+01 : f32
    %111 = vector.broadcast %cst_31 : f32 to vector<8x1xf32>
    %112 = arith.divf %110, %111 : vector<8x1xf32>
    %113 = vector.broadcast %105 : vector<8x1xf32> to vector<8x32xf32>
    %114 = arith.subf %101, %113 : vector<8x32xf32>
    %cst_32 = arith.constant 9.99999996E-13 : f32
    %115 = vector.broadcast %cst_32 : f32 to vector<8x1xf32>
    %116 = arith.addf %112, %115 : vector<8x1xf32>
    %117 = math.rsqrt %116 : vector<8x1xf32>
    %118 = vector.broadcast %117 : vector<8x1xf32> to vector<8x32xf32>
    %119 = arith.mulf %114, %118 : vector<8x32xf32>
    %120 = vector.broadcast %6 : vector<1x32xf32> to vector<8x32xf32>
    %121 = arith.mulf %119, %120 : vector<8x32xf32>
    %122 = vector.broadcast %7 : vector<1x32xf32> to vector<8x32xf32>
    %123 = arith.addf %121, %122 : vector<8x32xf32>
    %124 = arith.addf %83, %123 : vector<8x32xf32>
    %cst_33 = arith.constant dense<0.000000e+00> : vector<8xf32>
    %125 = vector.multi_reduction <add>, %124, %cst_33 [1] : vector<8x32xf32> to vector<8xf32>
    %126 = vector.shape_cast %125 : vector<8xf32> to vector<8x1xf32>
    %cst_34 = arith.constant 3.200000e+01 : f32
    %127 = vector.broadcast %cst_34 : f32 to vector<8x1xf32>
    %128 = arith.divf %126, %127 : vector<8x1xf32>
    %129 = vector.broadcast %128 : vector<8x1xf32> to vector<8x32xf32>
    %130 = arith.subf %124, %129 : vector<8x32xf32>
    %131 = arith.mulf %130, %130 : vector<8x32xf32>
    %cst_35 = arith.constant dense<0.000000e+00> : vector<8xf32>
    %132 = vector.multi_reduction <add>, %131, %cst_35 [1] : vector<8x32xf32> to vector<8xf32>
    %133 = vector.shape_cast %132 : vector<8xf32> to vector<8x1xf32>
    %cst_36 = arith.constant 3.200000e+01 : f32
    %134 = vector.broadcast %cst_36 : f32 to vector<8x1xf32>
    %135 = arith.divf %133, %134 : vector<8x1xf32>
    %136 = vector.broadcast %128 : vector<8x1xf32> to vector<8x32xf32>
    %137 = arith.subf %124, %136 : vector<8x32xf32>
    %cst_37 = arith.constant 9.99999974E-6 : f32
    %138 = vector.broadcast %cst_37 : f32 to vector<8x1xf32>
    %139 = arith.addf %135, %138 : vector<8x1xf32>
    %140 = math.rsqrt %139 : vector<8x1xf32>
    %141 = vector.broadcast %140 : vector<8x1xf32> to vector<8x32xf32>
    %142 = arith.mulf %137, %141 : vector<8x32xf32>
    %143 = vector.broadcast %8 : vector<1x32xf32> to vector<8x32xf32>
    %144 = arith.mulf %142, %143 : vector<8x32xf32>
    %145 = vector.broadcast %9 : vector<1x32xf32> to vector<8x32xf32>
    %146 = arith.addf %144, %145 : vector<8x32xf32>
    %c0_38 = arith.constant 0 : index
    %c0_39 = arith.constant 0 : index
    %147 = vector.load %arg9[%c0_38, %c0_39] : memref<8x32xf32, #tpu.memory_space<vmem>>, vector<8x32xf32>
    tpu.vector_store %arg9[%c0_38, %c0_39], %146 {strides = array<i32>} : memref<8x32xf32, #tpu.memory_space<vmem>>, vector<8x32xf32>,
    return
  }
  func.func @transform_0(%arg0: i32) -> (i32, i32) {
    %c0_i32 = arith.constant 0 : i32
    %c0_i32_0 = arith.constant 0 : i32
    return %arg0, %c0_i32 : i32, i32
  }
  func.func @transform_1(%arg0: i32) -> (i32, i32) {
    %c0_i32 = arith.constant 0 : i32
    %c0_i32_0 = arith.constant 0 : i32
    %c0_i32_1 = arith.constant 0 : i32
    return %c0_i32, %c0_i32_0 : i32, i32
  }
  func.func @transform_2(%arg0: i32) -> (i32, i32) {
    %c0_i32 = arith.constant 0 : i32
    %c0_i32_0 = arith.constant 0 : i32
    %c0_i32_1 = arith.constant 0 : i32
    return %c0_i32, %c0_i32_0 : i32, i32
  }
  func.func @transform_3(%arg0: i32) -> (i32, i32) {
    %c0_i32 = arith.constant 0 : i32
    %c0_i32_0 = arith.constant 0 : i32
    %c0_i32_1 = arith.constant 0 : i32
    return %c0_i32, %c0_i32_0 : i32, i32
  }
  func.func @transform_4(%arg0: i32) -> (i32, i32) {
    %c0_i32 = arith.constant 0 : i32
    %c0_i32_0 = arith.constant 0 : i32
    %c0_i32_1 = arith.constant 0 : i32
    return %c0_i32, %c0_i32_0 : i32, i32
  }
  func.func @transform_5(%arg0: i32) -> (i32, i32) {
    %c0_i32 = arith.constant 0 : i32
    %c0_i32_0 = arith.constant 0 : i32
    %c0_i32_1 = arith.constant 0 : i32
    return %c0_i32, %c0_i32_0 : i32, i32
  }
  func.func @transform_6(%arg0: i32) -> (i32, i32) {
    %c0_i32 = arith.constant 0 : i32
    %c0_i32_0 = arith.constant 0 : i32
    %c0_i32_1 = arith.constant 0 : i32
    return %c0_i32, %c0_i32_0 : i32, i32
  }
  func.func @transform_7(%arg0: i32) -> (i32, i32) {
    %c0_i32 = arith.constant 0 : i32
    %c0_i32_0 = arith.constant 0 : i32
    %c0_i32_1 = arith.constant 0 : i32
    return %c0_i32, %c0_i32_0 : i32, i32
  }
  func.func @transform_8(%arg0: i32) -> (i32, i32) {
    %c0_i32 = arith.constant 0 : i32
    %c0_i32_0 = arith.constant 0 : i32
    return %arg0, %c0_i32 : i32, i32
  }
}

</mosaic_0001>

<bundles_post_ra>
// kernel: tpu_custom_call.1
= control target key start
LH: loop header
LB: loop body
LE: loop exit
PB: predicated region body
PF: predicated region fallthrough
CT: control target
= control target key end

     0   :  { %s2607_s0 = inlined_call_operand.hbm [shape: f32[16,32], index: 0, kind: input, shape index: {}]   ;;  %s2608_s1 = inlined_call_operand.hbm [shape: f32[32,96], index: 1, kind: input, shape index: {}]   ;;  %s2609_s2 = inlined_call_operand.vmem [shape: f32[1,96], index: 2, kind: input, shape index: {}]   ;;  %s2610_s3 = inlined_call_operand.hbm [shape: f32[32,32], index: 3, kind: input, shape index: {}]   ;;  %s2611_s4 = inlined_call_operand.hbm [shape: f32[32,64], index: 4, kind: input, shape index: {}]   ;;  %s2612_s5 = inlined_call_operand.vmem [shape: f32[1,64], index: 5, kind: input, shape index: {}]   ;;  %s2613_s6 = inlined_call_operand.hbm [shape: f32[32,32], index: 6, kind: input, shape index: {}]   ;;  %s2614_s7 = inlined_call_operand.vmem [shape: f32[8,32], index: 7, kind: input, shape index: {}]   ;;  %s2615_s8 = inlined_call_operand.hbm [shape: f32[16,32], index: 8, kind: output, shape index: {}]  }
   0x1   :  { %2619 = sst [smem:[#allocation16_spill]] %s2608_s1 }
   0x2   :  { %13 = vsyncpa [#allocation3], 0 }
   0x3   :  { %15 = vsyncpa [#allocation3 + $0x1], 0 }
   0x4   :  { %16 = vsyncpa [#allocation6], 0 }
   0x5   :  { %17 = vsyncpa [#allocation9], 0 }
   0x6   :  { %18 = vsyncpa [#allocation4], 0 }
   0x7   :  { %20 = vsyncpa [#allocation4 + $0x1], 0  ;;  %s2187_s27 = smov 0   ;;  %s2189_s28 = smov 0  }
   0x8   :  { %s2191_s29 = smov 0   ;;  %s2193_s30 = smov 0  }
   0x9 LB: > { %s2123_s9 = smov [#allocation5]   ;;  %s2208_s11 = sadd.s32 4294967295, %s2121_s30   ;;  %s2121_s30 = sphi %s2193_s30, %s2641_s30   ;;  %s2117_s29 = sphi %s2191_s29, %s2640_s29   ;;  %s2113_s28 = sphi %s2189_s28, %s2639_s28   ;;  %s2109_s27 = sphi %s2187_s27, %s2638_s27  }
   0xa   : > { %s242_s10 = sshll.u32 %s2123_s9, 4  ;;  %p1597_p0 = scmp.ge.s32.totalorder %s2121_s30, 1  ;;  %s2213_s10 = int_to_ptr.vmem [resolvable:$true] %s242_s10 }
   0xb   : > { %p2616_p1 = scmp.eq.s32.totalorder %s2208_s11, 0  ;;  %p230_p2 = scmp.lt.s32.totalorder %s2121_s30, 3 }
   0xc   : > { %s2124_s13 = smov [#allocation8]   ;;  %s2125_s16 = smov [#allocation7]  }
   0xd   : > { %p2215_p3 = pnand %p1597_p0, %p230_p2  ;;  %s271_s14 = sshll.u32 %s2124_s13, 4  ;;  %s2228_s14 = int_to_ptr.vmem [resolvable:$true] %s271_s14 }
   0xe   : > { %s258_s17 = sshll.u32 %s2125_s16, 4  ;;  %s2622_s1 = sld [smem:[#allocation16_spill]]  ;;  %s2230_s17 = int_to_ptr.vmem [resolvable:$true] %s258_s17 }
   0xf   : > { %s2620_s12 = scalar_select %p2215_p3, 1, 0 }
  0x10   : > { %p1799_p5 = pneg %p2215_p3 }
  0x12   : > { %p2224_p6 = pnand %p1799_p5, %p2616_p1 }
  0x14   : > { %s1905_s20 = scalar_lea.hbm %s2622_s1, 512  ;;  %p2240_p8 = pneg %p2224_p6 }
  0x15   : > { %p1906_p7 = scmp.ne.s32.totalorder %s2622_s1, %s1905_s20  ;;  %p1912_p11 = scmp.lt.u32.totalorder %s1905_s20, %s2622_s1 }
  0x17   : > { %p1908_p9 = pnand %p2240_p8, %p1906_p7 }
  0x19   : > { %p1909_p10 = pneg %p1908_p9 }
  0x1b   : > { %p1914_p12 = pnand %p1912_p11, %p1909_p10 }
  0x1d   : > { %1917 = shalt.err (!%p1914_p12)
}
  0x1e   : > { %s1918_s26 = scalar_lea.vmem %s2213_s10, 512  ;;  %p1926_p5 = scmp.lt.s32.totalorder %s2213_s10, %s2213_s10 }
  0x1f   : > { %p1919_p13 = scmp.ne.s32.totalorder %s2213_s10, %s1918_s26  ;;  %p1927_p4 = scmp.lt.s32.totalorder %s1918_s26, %s1918_s26 }
  0x21   : > { %p1921_p0 = pnand %p1919_p13, %p2240_p8  ;;  %p1928_p7 = por %p1927_p4, %p1926_p5 }
  0x23   : > { %p1922_p2 = pneg %p1921_p0 }
  0x25   : > { %p1929_p9 = pnand %p1928_p7, %p1922_p2 }
  0x27   : > { %1932 = shalt.err (!%p1929_p9)
}
  0x28   : > { %s2126_s9 = smov 128   ;;  %s2127_s13 = smov 8  }
  0x29   : > { %1802 = dma.hbm_to_vmem [thread:$0]  (!%p2224_p6), %s2622_s1, 512, %s2213_s10, [#allocation6], %s2126_s9, %s2126_s9, %s2127_s13  }
  0x2a   : > { %s1933_s21 = scalar_lea.hbm %s2611_s4, 512 }
  0x2b   : > { %p1934_p4 = scmp.ne.s32.totalorder %s2611_s4, %s1933_s21  ;;  %p1940_p12 = scmp.lt.u32.totalorder %s1933_s21, %s2611_s4 }
  0x2d   : > { %p1936_p10 = pnand %p1934_p4, %p2240_p8 }
  0x2f   : > { %p1937_p11 = pneg %p1936_p10 }
  0x31   : > { %p1942_p13 = pnand %p1940_p12, %p1937_p11 }
  0x33   : > { %1945 = shalt.err (!%p1942_p13)
}
  0x34   : > { %s1946_s10 = scalar_lea.vmem %s2228_s14, 512  ;;  %p1954_p7 = scmp.lt.s32.totalorder %s2228_s14, %s2228_s14 }
  0x35   : > { %p1947_p0 = scmp.ne.s32.totalorder %s2228_s14, %s1946_s10  ;;  %p1955_p9 = scmp.lt.s32.totalorder %s1946_s10, %s1946_s10 }
  0x37   : > { %p1949_p2 = pnand %p1947_p0, %p2240_p8  ;;  %p1956_p4 = por %p1955_p9, %p1954_p7 }
  0x39   : > { %p1950_p5 = pneg %p1949_p2 }
  0x3b   : > { %p1957_p10 = pnand %p1956_p4, %p1950_p5 }
  0x3d   : > { %1960 = shalt.err (!%p1957_p10)
}
  0x3e   : > { %1808 = dma.hbm_to_vmem [thread:$0]  (!%p2224_p6), %s2611_s4, 512, %s2228_s14, [#allocation9], %s2126_s9, %s2126_s9, %s2127_s13  }
  0x3f   : > { %s1961_s21 = scalar_lea.hbm %s2610_s3, 512 }
  0x40   : > { %p1962_p11 = scmp.ne.s32.totalorder %s2610_s3, %s1961_s21  ;;  %p1968_p0 = scmp.lt.u32.totalorder %s1961_s21, %s2610_s3 }
  0x42   : > { %p1964_p12 = pnand %p1962_p11, %p2240_p8 }
  0x44   : > { %p1965_p13 = pneg %p1964_p12 }
  0x46   : > { %p1970_p2 = pnand %p1968_p0, %p1965_p13 }
  0x48   : > { %1973 = shalt.err (!%p1970_p2)
}
  0x49   : > { %s1974_s14 = scalar_lea.vmem %s2230_s17, 512  ;;  %p1982_p4 = scmp.lt.s32.totalorder %s2230_s17, %s2230_s17 }
  0x4a   : > { %p1975_p5 = scmp.ne.s32.totalorder %s2230_s17, %s1974_s14  ;;  %p1983_p10 = scmp.lt.s32.totalorder %s1974_s14, %s1974_s14 }
  0x4c   : > { %p1977_p7 = pnand %p1975_p5, %p2240_p8  ;;  %p1984_p11 = por %p1983_p10, %p1982_p4 }
  0x4e   : > { %p1978_p9 = pneg %p1977_p7 }
  0x50   : > { %p1985_p12 = pnand %p1984_p11, %p1978_p9 }
  0x52   : > { %1988 = shalt.err (!%p1985_p12)
}
  0x53   : > { %1805 = dma.hbm_to_vmem [thread:$0]  (!%p2224_p6), %s2610_s3, 512, %s2230_s17, [#allocation6], %s2126_s9, %s2126_s9, %s2127_s13  }
  0x54   : > { %s2128_s18 = smov [#allocation10]   ;;  %s1989_s22 = scalar_lea.hbm %s2613_s6, 512 }
  0x55   : > { %s287_s19 = sshll.u32 %s2128_s18, 4  ;;  %p1990_p13 = scmp.ne.s32.totalorder %s2613_s6, %s1989_s22  ;;  %s288_s19 = int_to_ptr.vmem [resolvable:$true] %s287_s19 }
  0x56   : > { %p1996_p5 = scmp.lt.u32.totalorder %s1989_s22, %s2613_s6 }
  0x57   : > { %p1992_p0 = pnand %p1990_p13, %p2240_p8 }
  0x59   : > { %p1993_p2 = pneg %p1992_p0 }
  0x5b   : > { %p1998_p7 = pnand %p1996_p5, %p1993_p2 }
  0x5d   : > { %2001 = shalt.err (!%p1998_p7)
}
  0x5e   : > { %s2002_s17 = scalar_lea.vmem %s288_s19, 512  ;;  %p2010_p11 = scmp.lt.s32.totalorder %s288_s19, %s288_s19 }
  0x5f   : > { %p2003_p9 = scmp.ne.s32.totalorder %s288_s19, %s2002_s17  ;;  %p2011_p12 = scmp.lt.s32.totalorder %s2002_s17, %s2002_s17 }
  0x61   : > { %p2005_p4 = pnand %p2003_p9, %p2240_p8  ;;  %p2012_p1 = por %p2011_p12, %p2010_p11 }
  0x63   : > { %p2006_p10 = pneg %p2005_p4 }
  0x65   : > { %p2013_p3 = pnand %p2012_p1, %p2006_p10 }
  0x67   : > { %2016 = shalt.err (!%p2013_p3)
}
  0x68   : > { %1811 = dma.hbm_to_vmem [thread:$0]  (!%p2224_p6), %s2613_s6, 512, %s288_s19, [#allocation9], %s2126_s9, %s2126_s9, %s2127_s13  }
  0x69   : > { %s1596_s15 = sadd.s32 4294967294, %s2121_s30   ;;  %s2339_s23 = sadd.s32 1, %s2121_s30  }
  0x6a   : > { %s30_s18 = ssub.s32 %s2121_s30, %s2339_s23  ;;  %s33_s20 = sadd.s32 1, %s2117_s29 }
  0x6b   : > { %p31_p1 = scmp.eq.s32.totalorder %s30_s18, 0  ;;  %p40_p3 = scmp.ne.s32.totalorder %s2117_s29, %s2113_s28 }
  0x6c   : > { %p41_p8 = scmp.eq.s32.totalorder %s2121_s30, 0  ;;  %p46_p13 = scmp.ne.s32.totalorder %s2113_s28, %s2109_s27 }
  0x6d   : > { %s2350_s21 = scalar_select %p31_p1, %s2117_s29, %s33_s20  }
  0x6e   : > { %p2352_p0 = por %p41_p8, %p40_p3  ;;  %p2625_p2 = scmp.eq.s32.totalorder %s2208_s11, 0 }
  0x6f   : > { %p217_p5 = scmp.eq.s32.totalorder %s2208_s11, 1  ;;  %p223_p7 = scmp.eq.s32.totalorder %s1596_s15, 1 }
  0x70   : > { %p2358_p6 = por %p2625_p2, %p46_p13  ;;  %p1824_p9 = scmp.lt.s32.totalorder %s2121_s30, 2 }
  0x71   : > { %s304_s13 = sand.u32 1, %s2117_s29   ;;  %p2365_p4 = por %p217_p5, %p40_p3 }
  0x72   : > { %p2369_p10 = por %p223_p7, %p46_p13  ;;  %s1603_s25 = sshll.u32 %s304_s13, 3 }
  0x73   : > { %s2627_s19 = scalar_select %p2365_p4, 1, 0 }
  0x74   : > { %s2628_s24 = scalar_select %p2369_p10, 1, 0 }
  0x75   : > { %s1604_s26 = sshll.u32 %s2121_s30, 7  ;;  %s308_s16 = scalar_lea.vmem [#allocation2], %s1603_s25 }
  0x76   : > { %s2377_s10 = scalar_lea.hbm %s2607_s0, %s1604_s26  ;;  %s315_s15 = sshll.u32 %s308_s16, 4  ;;  %s2379_s15 = int_to_ptr.vmem [resolvable:$true] %s315_s15 }
  0x77   : > { %p2383_p11 = pnand %p1824_p9, %p2352_p0  ;;  %s305_s20 = scalar_lea.sflag [#allocation3], %s304_s13 }
  0x78   : > { %s2017_s1 = scalar_lea.hbm %s2377_s10, 128  ;;  %s2022_s14 = scalar_lea.hbm %s2607_s0, 256 }
  0x79   : > { %p2018_p12 = scmp.ne.s32.totalorder %s2377_s10, %s2017_s1  ;;  %p2019_p1 = pneg %p2383_p11 }
  0x7a   : > { %p2023_p13 = scmp.lt.u32.totalorder %s2377_s10, %s2607_s0  ;;  %p2024_p0 = scmp.lt.u32.totalorder %s2022_s14, %s2017_s1 }
  0x7b   : > { %p2020_p3 = pnand %p2019_p1, %p2018_p12  ;;  %p2026_p5 = scmp.lt.u32.totalorder %s2017_s1, %s2377_s10 }
  0x7c   : > { %p2025_p2 = por %p2024_p0, %p2023_p13 }
  0x7d   : > { %p2021_p8 = pneg %p2020_p3 }
  0x7e   : > { %p2027_p7 = por %p2026_p5, %p2025_p2 }
  0x80   : > { %p2028_p9 = pnand %p2027_p7, %p2021_p8 }
  0x82   : > { %2031 = shalt.err (!%p2028_p9)
}
  0x83   : > { %s2032_s13 = scalar_lea.vmem %s2379_s15, 128  ;;  %s2129_s16 = smov [#allocation2]  }
  0x84   : > { %p2033_p12 = scmp.ne.s32.totalorder %s2379_s15, %s2032_s13  ;;  %s2037_s25 = sshll.u32 %s2129_s16, 4  ;;  %s2038_s25 = int_to_ptr.vmem [resolvable:$false] %s2037_s25 }
  0x85   : > { %s2039_s26 = scalar_lea.vmem %s2038_s25, 256  ;;  %p2040_p4 = scmp.lt.s32.totalorder %s2379_s15, %s2038_s25 }
  0x86   : > { %p2035_p3 = pnand %p2033_p12, %p2019_p1  ;;  %p2041_p13 = scmp.lt.s32.totalorder %s2039_s26, %s2032_s13 }
  0x88   : > { %p2036_p10 = pneg %p2035_p3  ;;  %p2042_p0 = por %p2041_p13, %p2040_p4 }
  0x8a   : > { %p2043_p2 = pnand %p2042_p0, %p2036_p10 }
  0x8c   : > { %2046 = shalt.err (!%p2043_p2)
}
  0x8d   : > { %1815 = dma.hbm_to_vmem [thread:$0]  (!%p2383_p11), %s2377_s10, 128, %s2379_s15, %s305_s20  }
  0x8e   : > { %p2630_p8 = scmp.ne.s32.totalorder %s2620_s12, 0 }
  0x8f   : > { %s2415_s1 = sand.u32 (!%p2630_p8), 1, %s2113_s28  }
  0x90   : > { %324 = sbr.rel (%p2630_p8) target bundleno = 3222 (0xc96), region = 52  ;;  %s1606_s14 = sshll.u32 (!%p2630_p8), %s2415_s1, 3 }
  0x91   : > { %s327_s22 = scalar_lea.sflag (!%p2630_p8), [#allocation3], %s2415_s1  ;;  %s330_s17 = scalar_lea.vmem (!%p2630_p8), [#allocation2], %s1606_s14 }
  0x97   : > { %2092 = dma.done.wait (%p2358_p6), %s327_s22, 128  }
  0x98   : > { %2094 = vsyncadd (%p2358_p6), %s327_s22, 4294967168  ;;  %p2631_p4 = scmp.eq.s32.totalorder %s2208_s11, 0 }
  0x9a   : > { %2096 = dma.done.wait (%p2631_p4), [#allocation6], 1024   ;;  %p2632_p10 = pmov %p2631_p4 }
  0x9b   : > { %p2633_p11 = pmov %p2631_p4 }
  0x9c   : > { %2098 = vsyncadd (%p2632_p10), [#allocation6], 4294966272 }
  0x9d   : > { %2100 = dma.done.wait (%p2633_p11), [#allocation9], 1024   ;;  %p2634_p1 = pmov %p2631_p4 }
  0x9e   : > { %v2130_v0 = vmov 0.0|0.0   ;;  %vm2131_vm0 = vmmov 0   ;;  %v2132_v1 = vmov 0.0   ;;  %v381_v2 = vld [vmem:[#allocation5] sm:$0xff]  ;;  %v382_v3 = vld [vmem:[#allocation5 + $0x8] sm:$0xff]  ;;  %v383_v4 = vld [vmem:[#allocation5 + $0x10] sm:$0xff] }
  0x9f   : > { %2102 = vsyncadd (%p2634_p1), [#allocation9], 4294966272  ;;  %1755 = vmatprep.subr.bf16.mxu0 %v2130_v0  ;;  %1679 = vmatprep.mubr.msk.f32.mxu0 %vm2131_vm0, %v2132_v1  ;;  %v1756_v5 = vpack.c.bf16 %v382_v3, %v381_v2  ;;  %v384_v6 = vld [vmem:[#allocation5 + $0x18] sm:$0xff]  ;;  %vm392_vm1 = vcmask 261120   ;;  %v1612_v9 = vld [vmem:[%s2609_s2] ss:$0 sm:$0xff] }
  0xa0   : > { %1682 = vmatprep.subr.mxu1 %v2132_v1  ;;  %1684 = vmatprep.mubr.msk.f32.mxu1 %vm2131_vm0, %v2132_v1  ;;  %v1759_v7 = vpack.c.bf16 %v384_v6, %v383_v4  ;;  %v2440_v8 = vld [vmem:[%s330_s17] sm:$0xff]  ;;  %s2133_s10 = smov 104   ;;  %s2134_s15 = smov 120   ;;  %vm475_vm2 = vcmask 64512   ;;  %vm1139_vm3 = vcmask 130048   ;;  %vm1141_vm4 = vcmask 195584  }
  0xa1   : > { %1757 = vmatpush3.bf16.msra.mxu0 %v1756_v5  ;;  %s2135_s18 = smov 96   ;;  %s2136_s20 = smov 112  }
  0xa2   : > { %1758 = vmatprep.subr.bf16.mxu0 %v2130_v0  ;;  %s2137_s13 = smov 64   ;;  %s2138_s16 = smov 8  }
  0xa3   : > { %s2139_s25 = smov 16   ;;  %s2140_s26 = smov 24  }
  0xa4   : > { %p2635_p5 = scmp.ne.s32.totalorder %s2627_s19, 0 }
  0xa5   : > { %1760 = vmatpush3.bf16.msra.mxu0 %v1759_v7 }
  0xa6   : > { %1702 = vmatprep.subr.mxu0 %v2132_v1 }
  0xa8   : > { %1680 = vmatmul.mubr.msk.f32.vlgmr.msra.gmra.mrb[0].mxu0 %vm392_vm1, %v2440_v8 }
  0xa9   : > { %1704 = vmatprep.mubr.msk.f32.mxu0 %vm2131_vm0, %v2132_v1 }
 0x17b   : > { %v462_v10 = vpop.f32.mrb[0].mxu0 }
 0x17c   : > { %v463_v11 = vadd.f32 %v1612_v9, %v462_v10  ;;  %v1681_v12 = vpop.f32.mrb[1].mxu0  ;;  %v1143_v9 = vld [vmem:[#allocation7] sm:$0xff]  ;;  %v1144_v10 = vld [vmem:[#allocation7 + $0x8] sm:$0xff] }
 0x17d   : > { %v1145_v12 = vld [vmem:[#allocation7 + $0x10] sm:$0xff] }
 0x17e   : > { %471 = vrot.lane.b32.xlu1 %v463_v11, %s2133_s10  ;;  %467 = vrot.lane.b32.xlu0 %v463_v11, %s2134_s15  ;;  %s1632_s10 = sshll.u32 %s2208_s11, 7  ;;  %s378_s15 = scalar_lea.vmem [#allocation11], %s1606_s14 }
 0x17f   : > { %s2141_s11 = smov [#allocation11]  }
 0x180   : > { %s2051_s14 = sshll.u32 %s2141_s11, 4  ;;  %s2052_s14 = int_to_ptr.vmem [resolvable:$false] %s2051_s14 }
 0x181   : > { %s2053_s22 = scalar_lea.vmem %s2052_s14, 256 }
 0x182   : > { %473 = vrot.lane.b32.xlu1 %v463_v11, %s2135_s18  ;;  %469 = vrot.lane.b32.xlu0 %v463_v11, %s2136_s20 }
 0x1f0   : > { %v2451_v13 = vpop.permute.xlu1 %471  ;;  %v468_v14 = vpop.permute.xlu0 %467 }
 0x1f1   : > { %550 = vrot.lane.b32.xlu0 %v468_v14, %s2135_s18 }
 0x1f4   : > { %v474_v15 = vpop.permute.xlu1 %473  ;;  %v2454_v16 = vpop.permute.xlu0 %469 }
 0x1f5   : > { %1683 = vmatpush3.xpose.msk.msra.mxu1 %vm475_vm2, %v474_v15  ;;  %702 = vrot.lane.b32.xlu0 %v2451_v13, %s2135_s18 }
 0x1f6   : > { %626 = vrot.lane.b32.xlu1 %v2454_v16, %s2135_s18  ;;  %1687 = vmatprep.subr.mxu1 %v2132_v1 }
 0x1f8   : > { %1685 = vmatmul.mubr.msk.f32.vlgmr.msra.gmra.mrb[0].mxu1 %vm475_vm2, %v463_v11 }
 0x1f9   : > { %1689 = vmatprep.mubr.msk.f32.mxu1 %vm2131_vm0, %v2132_v1 }
 0x263   : > { %v551_v17 = vpop.permute.xlu0 %550 }
 0x264   : > { %1688 = vmatpush3.xpose.msk.msra.mxu1 %vm475_vm2, %v551_v17 }
 0x265   : > { %1692 = vmatprep.subr.mxu1 %v2132_v1 }
 0x267   : > { %1690 = vmatmul.mubr.msk.f32.vlgmr.msra.gmra.mrb[2].mxu1 %vm475_vm2, %v468_v14  ;;  %v703_v19 = vpop.permute.xlu0 %702 }
 0x268   : > { %v627_v18 = vpop.permute.xlu1 %626  ;;  %1694 = vmatprep.mubr.msk.f32.mxu1 %vm2131_vm0, %v2132_v1 }
 0x269   : > { %1693 = vmatpush3.xpose.msk.msra.mxu1 %vm475_vm2, %v627_v18 }
 0x26a   : > { %1697 = vmatprep.subr.mxu1 %v2132_v1 }
 0x26c   : > { %1695 = vmatmul.mubr.msk.f32.vlgmr.msra.gmra.mrb[4].mxu1 %vm475_vm2, %v2454_v16 }
 0x26d   : > { %1698 = vmatpush3.xpose.msk.msra.mxu1 %vm475_vm2, %v703_v19  ;;  %1699 = vmatprep.mubr.msk.f32.mxu1 %vm2131_vm0, %v2132_v1 }
 0x26e   : > { %1707 = vmatprep.subr.mxu1 %v2132_v1 }
 0x270   : > { %1700 = vmatmul.mubr.msk.f32.vlgmr.msra.gmra.mrb[6].mxu1 %vm475_vm2, %v2451_v13 }
 0x271   : > { %1709 = vmatprep.mubr.msk.f32.mxu1 %vm2131_vm0, %v2132_v1 }
 0x2cb   : > { %v546_v20 = vpop.f32.mrb[0].mxu1 }
 0x2cc   : > { %v1686_v21 = vpop.f32.mrb[1].mxu1  ;;  %v778_v22 = vsel %vm475_vm2, %v546_v20, -inf }
 0x2cd   : > { %779 = vmax.xlane.f32.xlu1 %v778_v22 }
 0x33a   : > { %v622_v23 = vpop.f32.mrb[2].mxu1 }
 0x33b   : > { %v1691_v24 = vpop.f32.mrb[3].mxu1  ;;  %v781_v25 = vsel %vm475_vm2, %v622_v23, -inf }
 0x33c   : > { %782 = vmax.xlane.f32.xlu0 %v781_v25 }
 0x33f   : > { %v698_v26 = vpop.f32.mrb[4].mxu1 }
 0x340   : > { %v1696_v27 = vpop.f32.mrb[5].mxu1  ;;  %v784_v28 = vsel %vm475_vm2, %v698_v26, -inf }
 0x341   : > { %785 = vmax.xlane.f32.xlu0 %v784_v28  ;;  %v1147_v27 = vlaneseq }
 0x343   : > { %v774_v29 = vpop.f32.mrb[6].mxu1  ;;  %v2518_v28 = vshrl.u32 %v1147_v27, 7 }
 0x344   : > { %v1701_v30 = vpop.f32.mrb[7].mxu1  ;;  %v787_v31 = vsel %vm475_vm2, %v774_v29, -inf }
 0x345   : > { %788 = vmax.xlane.f32.xlu1 %v787_v31  ;;  %v2524_v30 = vld [vmem:[%s2614_s7] sm:$0xff]  ;;  %v1446_v27 = vsub.s32 5, %v2518_v28 }
 0x356   : > { %898 = vrot.lane.b32.xlu1 %v468_v14, %s2137_s13 }
 0x357   : > { %822 = vrot.lane.b32.xlu0 %v463_v11, %s2137_s13  ;;  %v1762_v11 = vpack.c.bf16 %v1144_v10, %v1143_v9 }
 0x35a   : > { %v780_v32 = vpop.xlane.xlu1 %779 }
 0x35b   : > { %v790_v33 = vsub.f32 %v546_v20, %v780_v32 }
 0x35d   : > { %v794_v34 = vmul.f32 1.442695, %v790_v33 }
 0x35f   : > { %1879 = vpow2.f32 %v794_v34 }
 0x369   : > { %v1880_v35 = vpop.eup %1879 }
 0x36a   : > { %v802_v36 = vsel %vm475_vm2, %v1880_v35, 0.0 }
 0x376   : > { %803 = vadd.xlane.f32.xlu0 %v802_v36 }
 0x3c9   : > { %v783_v37 = vpop.xlane.xlu0 %782 }
 0x3ca   : > { %v791_v38 = vsub.f32 %v622_v23, %v783_v37 }
 0x3cc   : > { %v796_v39 = vmul.f32 1.442695, %v791_v38 }
 0x3ce   : > { %1881 = vpow2.f32 %v796_v39  ;;  %v786_v40 = vpop.xlane.xlu0 %785 }
 0x3cf   : > { %v792_v41 = vsub.f32 %v698_v26, %v786_v40 }
 0x3d1   : > { %v798_v42 = vmul.f32 1.442695, %v792_v41  ;;  %v1249_v41 = vld [vmem:[#allocation8] sm:$0xff] }
 0x3d2   : > { %v789_v43 = vpop.xlane.xlu1 %788  ;;  %v823_v44 = vpop.permute.xlu0 %822 }
 0x3d3   : > { %1883 = vpow2.f32 %v798_v42  ;;  %v793_v45 = vsub.f32 %v774_v29, %v789_v43  ;;  %1703 = vmatpush3.msra.mxu0 %v823_v44  ;;  %v1149_v29 = vsub.s32 0, %v2518_v28  ;;  %v1250_v42 = vld [vmem:[#allocation8 + $0x8] sm:$0xff]  ;;  %v1251_v44 = vld [vmem:[#allocation8 + $0x10] sm:$0xff] }
 0x3d4   : > { %1712 = vmatprep.subr.mxu0 %v2132_v1  ;;  %v1768_v43 = vpack.c.bf16 %v1250_v42, %v1249_v41 }
 0x3d5   : > { %v800_v46 = vmul.f32 1.442695, %v793_v45  ;;  %v1150_v31 = vrot.slane %v2524_v30, %v1149_v29  ;;  %v1252_v45 = vld [vmem:[#allocation8 + $0x18] sm:$0xff] }
 0x3d6   : > { %v899_v47 = vpop.permute.xlu1 %898 }
 0x3d7   : > { %1885 = vpow2.f32 %v800_v46  ;;  %1708 = vmatpush3.msra.mxu1 %v899_v47  ;;  %v1771_v46 = vpack.c.bf16 %v1252_v45, %v1251_v44  ;;  %v1465_v45 = vsub.s32 6, %v2518_v28 }
 0x3d8   : > { %v1882_v48 = vpop.eup %1881  ;;  %1717 = vmatprep.subr.mxu1 %v2132_v1 }
 0x3d9   : > { %v805_v49 = vsel %vm475_vm2, %v1882_v48, 0.0 }
 0x3da   : > { %806 = vadd.xlane.f32.xlu1 %v805_v49  ;;  %v1241_v49 = vsub.s32 2, %v2518_v28 }
 0x3dd   : > { %v1884_v50 = vpop.eup %1883 }
 0x3de   : > { %v808_v51 = vsel %vm475_vm2, %v1884_v50, 0.0 }
 0x3df   : > { %809 = vadd.xlane.f32.xlu0 %v808_v51  ;;  %v1242_v51 = vrot.slane %v2524_v30, %v1241_v49 }
 0x3e1   : > { %v1886_v52 = vpop.eup %1885 }
 0x3e2   : > { %v811_v53 = vsel %vm475_vm2, %v1886_v52, 0.0 }
 0x3e3   : > { %812 = vadd.xlane.f32.xlu1 %v811_v53 }
 0x3f4   : > { %974 = vrot.lane.b32.xlu1 %v2454_v16, %s2137_s13 }
 0x3f5   : > { %1050 = vrot.lane.b32.xlu0 %v2451_v13, %s2137_s13  ;;  %v1146_v13 = vld [vmem:[#allocation7 + $0x18] sm:$0xff] }
 0x3f6   : > { %v1765_v14 = vpack.c.bf16 %v1146_v13, %v1145_v12 }
 0x403   : > { %v804_v54 = vpop.xlane.xlu0 %803 }
 0x404   : > { %1887 = vrcp.f32 %v804_v54 }
 0x40e   : > { %v1888_v55 = vpop.eup %1887 }
 0x40f   : > { %v818_v56 = vmul.f32 %v1888_v55, %v1880_v35 }
 0x411   : > { %1705 = vmatmul.mubr.msk.f32.vlgmr.msra.gmra.mrb[2].mxu0 %vm475_vm2, %v818_v56 }
 0x412   : > { %1714 = vmatprep.mubr.msk.f32.mxu0 %vm2131_vm0, %v2132_v1 }
 0x467   : > { %v807_v57 = vpop.xlane.xlu1 %806 }
 0x468   : > { %1889 = vrcp.f32 %v807_v57  ;;  %v1344_v57 = vld [vmem:[#allocation10] sm:$0xff] }
 0x46c   : > { %v810_v58 = vpop.xlane.xlu0 %809 }
 0x46d   : > { %1891 = vrcp.f32 %v810_v58  ;;  %v1345_v58 = vld [vmem:[#allocation10 + $0x8] sm:$0xff] }
 0x470   : > { %v813_v59 = vpop.xlane.xlu1 %812  ;;  %v1051_v63 = vpop.permute.xlu0 %1050 }
 0x471   : > { %1893 = vrcp.f32 %v813_v59  ;;  %v1346_v59 = vld [vmem:[#allocation10 + $0x10] sm:$0xff] }
 0x472   : > { %v1890_v60 = vpop.eup %1889 }
 0x473   : > { %v819_v61 = vmul.f32 %v1890_v60, %v1882_v48  ;;  %v1774_v60 = vpack.c.bf16 %v1345_v58, %v1344_v57 }
 0x474   : > { %v975_v62 = vpop.permute.xlu1 %974 }
 0x475   : > { %1713 = vmatpush3.msra.mxu0 %v975_v62  ;;  %1710 = vmatmul.mubr.msk.f32.vlgmr.msra.gmra.mrb[8].mxu1 %vm475_vm2, %v819_v61  ;;  %v1347_v61 = vld [vmem:[#allocation10 + $0x18] sm:$0xff] }
 0x476   : > { %1718 = vmatpush3.msra.mxu1 %v1051_v63  ;;  %1719 = vmatprep.mubr.msk.f32.mxu1 %vm2131_vm0, %v2132_v1  ;;  %v1777_v62 = vpack.c.bf16 %v1347_v61, %v1346_v59  ;;  %v1627_v63 = vld [vmem:[%s2612_s5] ss:$0 sm:$0xff] }
 0x477   : > { %v1892_v2 = vpop.eup %1891  ;;  %1761 = vmatprep.subr.bf16.mxu0 %v2130_v0  ;;  %1767 = vmatprep.subr.bf16.mxu1 %v2130_v0 }
 0x478   : > { %v820_v3 = vmul.f32 %v1892_v2, %v1884_v50  ;;  %v1246_v50 = vsub.s32 3, %v2518_v28 }
 0x47a   : > { %1715 = vmatmul.mubr.msk.f32.vlgmr.msra.gmra.mrb[4].mxu0 %vm475_vm2, %v820_v3  ;;  %v1247_v54 = vrot.slane %v2524_v30, %v1246_v50 }
 0x47b   : > { %v1894_v4 = vpop.eup %1893  ;;  %1730 = vmatprep.mubr.msk.f32.mxu0 %vm2131_vm0, %v2132_v1  ;;  %1763 = vmatpush3.bf16.msra.mxu0 %v1762_v11 }
 0x47c   : > { %v821_v5 = vmul.f32 %v1894_v4, %v1886_v52  ;;  %1764 = vmatprep.subr.bf16.mxu0 %v2130_v0 }
 0x47e   : > { %1720 = vmatmul.mubr.msk.f32.vlgmr.msra.gmra.mrb[10].mxu1 %vm475_vm2, %v821_v5 }
 0x47f   : > { %1741 = vmatprep.mubr.msk.f32.mxu1 %vm2131_vm0, %v2132_v1  ;;  %1766 = vmatpush3.bf16.msra.mxu0 %v1765_v14 }
 0x480   : > { %1773 = vmatprep.subr.bf16.mxu0 %v2130_v0  ;;  %1769 = vmatpush3.bf16.msra.mxu1 %v1768_v43 }
 0x481   : > { %1770 = vmatprep.subr.bf16.mxu1 %v2130_v0 }
 0x484   : > { %1772 = vmatpush3.bf16.msra.mxu1 %v1771_v46  ;;  %v1470_v46 = vsub.s32 7, %v2518_v28 }
 0x486   : > { %v1471_v49 = vrot.slane %v2524_v30, %v1470_v46 }
 0x4e4   : > { %v894_v6 = vpop.f32.mrb[2].mxu0 }
 0x4e5   : > { %v1706_v7 = vpop.f32.mrb[3].mxu0 }
 0x548   : > { %v970_v15 = vpop.f32.mrb[8].mxu1 }
 0x549   : > { %1127 = vrot.lane.b32.xlu1 %v970_v15, %s2138_s16  ;;  %v1711_v16 = vpop.f32.mrb[9].mxu1  ;;  %s2562_s16 = scalar_lea.hbm %s2615_s8, %s1632_s10 }
 0x54d   : > { %v1046_v17 = vpop.f32.mrb[4].mxu0 }
 0x54e   : > { %1131 = vrot.lane.b32.xlu0 %v1046_v17, %s2139_s25  ;;  %v1716_v18 = vpop.f32.mrb[5].mxu0  ;;  %s1475_s25 = scalar_lea.sflag [#allocation4], %s2415_s1 }
 0x551   : > { %v1122_v19 = vpop.f32.mrb[10].mxu1 }
 0x552   : > { %1135 = vrot.lane.b32.xlu1 %v1122_v19, %s2140_s26  ;;  %v1721_v20 = vpop.f32.mrb[11].mxu1 }
 0x5bb   : > { %v1128_v21 = vpop.permute.xlu1 %1127 }
 0x5bc   : > { %v1138_v23 = vsel %vm475_vm2, %v894_v6, %v1128_v21 }
 0x5c0   : > { %v1132_v22 = vpop.permute.xlu0 %1131 }
 0x5c1   : > { %v1140_v24 = vsel %vm1139_vm3, %v1138_v23, %v1132_v22 }
 0x5c4   : > { %v1136_v25 = vpop.permute.xlu1 %1135 }
 0x5c5   : > { %v1142_v26 = vsel %vm1141_vm4, %v1140_v24, %v1136_v25 }
 0x5c6   : > { %1731 = vmatmul.mubr.msk.f32.vlgmr.msra.gmra.mrb[6].mxu0 %vm392_vm1, %v1142_v26  ;;  %v1441_v26 = vsub.s32 4, %v2518_v28 }
 0x5c7   : > { %1752 = vmatprep.mubr.msk.f32.mxu0 %vm2131_vm0, %v2132_v1  ;;  %1775 = vmatpush3.bf16.msra.mxu0 %v1774_v60 }
 0x5c8   : > { %1776 = vmatprep.subr.bf16.mxu0 %v2130_v0  ;;  %v1350_v0 = vsub.s32 1, %v2518_v28  ;;  %v1442_v29 = vrot.slane %v2524_v30, %v1441_v26 }
 0x5ca   : > { %v1351_v12 = vrot.slane %v2524_v30, %v1350_v0 }
 0x5cb   : > { %1778 = vmatpush3.bf16.msra.mxu0 %v1777_v62 }
 0x699   : > { %v1220_v32 = vpop.f32.mrb[6].mxu0 }
 0x69a   : > { %v1221_v33 = vadd.f32 %v1220_v32, %v1150_v31  ;;  %v1732_v34 = vpop.f32.mrb[7].mxu0 }
 0x69c   : > { %v1224_v35 = vadd.f32 %v1221_v33, %v2440_v8  ;;  %v1447_v33 = vrot.slane %v2524_v30, %v1446_v27 }
 0x69e   : > { %v1225_v36 = vsel %vm392_vm1, %v1224_v35, 0.0 }
 0x69f   : > { %1226 = vadd.xlane.f32.xlu0 %v1225_v36 }
 0x72c   : > { %v1227_v1 = vpop.xlane.xlu0 %1226 }
 0x72d   : > { %v1229_v37 = vmul.f32 0.03125, %v1227_v1 }
 0x72f   : > { %v1230_v38 = vsub.f32 %v1224_v35, %v1229_v37 }
 0x731   : > { %v1231_v39 = vmul.f32 %v1230_v38, %v1230_v38 }
 0x733   : > { %v1232_v40 = vsel %vm392_vm1, %v1231_v39, 0.0 }
 0x734   : > { %1233 = vadd.xlane.f32.xlu1 %v1232_v40 }
 0x7c1   : > { %v1234_v8 = vpop.xlane.xlu1 %1233 }
 0x7c2   : > { %v1235_v47 = vmul.f32 0.03125, %v1234_v8  ;;  %v1466_v8 = vrot.slane %v2524_v30, %v1465_v45 }
 0x7c4   : > { %v1236_v48 = vadd.f32 1e-05, %v1235_v47 }
 0x7c6   : > { %1895 = vrsqrt.f32 %v1236_v48 }
 0x7d0   : > { %v1896_v52 = vpop.eup %1895 }
 0x7d1   : > { %v1238_v53 = vmul.f32 %v1896_v52, %v1230_v38 }
 0x7d3   : > { %v1243_v55 = vmul.f32 %v1242_v51, %v1238_v53 }
 0x7d5   : > { %v1248_v56 = vadd.f32 %v1247_v54, %v1243_v55 }
 0x7d7   : > { %1742 = vmatmul.mubr.msk.f32.vlgmr.msra.gmra.mrb[12].mxu1 %vm392_vm1, %v1248_v56 }
 0x8aa   : > { %v1329_v2 = vpop.f32.mrb[12].mxu1 }
 0x8ab   : > { %v1330_v3 = vadd.f32 %v1627_v63, %v1329_v2  ;;  %v1743_v4 = vpop.f32.mrb[13].mxu1 }
 0x8ad   : > { %v1629_v5 = vmul.f32 -1.442695, %v1330_v3 }
 0x8af   : > { %1897 = vpow2.f32 %v1629_v5 }
 0x8b9   : > { %v1898_v6 = vpop.eup %1897 }
 0x8ba   : > { %v1336_v7 = vadd.f32 1.0, %v1898_v6 }
 0x8bc   : > { %1899 = vrcp.f32 %v1336_v7 }
 0x8c6   : > { %v1900_v9 = vpop.eup %1899 }
 0x8c7   : > { %1340 = vrot.lane.b32.xlu0 %v1900_v9, %s2135_s18  ;;  %s1488_s18 = sshll.u32 %s378_s15, 4  ;;  %s2564_s18 = int_to_ptr.vmem [resolvable:$true] %s1488_s18 }
 0x8c8   : > { %s2047_s26 = scalar_lea.vmem %s2564_s18, 128  ;;  %p2054_p12 = scmp.lt.s32.totalorder %s2564_s18, %s2052_s14 }
 0x8c9   : > { %p2048_p6 = scmp.ne.s32.totalorder %s2564_s18, %s2047_s26  ;;  %p2055_p3 = scmp.lt.s32.totalorder %s2053_s22, %s2047_s26 }
 0x8cb   : > { %p2049_p7 = pnand %p2048_p6, %p2635_p5  ;;  %p2056_p13 = por %p2055_p3, %p2054_p12 }
 0x8cd   : > { %p2050_p9 = pneg %p2049_p7 }
 0x8cf   : > { %p2057_p0 = pnand %p2056_p13, %p2050_p9 }
 0x939   : > { %v1341_v10 = vpop.permute.xlu0 %1340 }
 0x93a   : > { %v1343_v11 = vmul.f32 %v1341_v10, %v1330_v3 }
 0x93c   : > { %1753 = vmatmul.mubr.msk.f32.vlgmr.msra.gmra.mrb[8].mxu0 %vm392_vm1, %v1343_v11 }
 0xa0f   : > { %v1421_v13 = vpop.f32.mrb[8].mxu0 }
 0xa10   : > { %v1422_v14 = vadd.f32 %v1421_v13, %v1351_v12  ;;  %v1754_v15 = vpop.f32.mrb[9].mxu0 }
 0xa12   : > { %v1425_v16 = vadd.f32 %v1422_v14, %v1248_v56 }
 0xa14   : > { %v1426_v17 = vsel %vm392_vm1, %v1425_v16, 0.0 }
 0xa15   : > { %1427 = vadd.xlane.f32.xlu1 %v1426_v17 }
 0xaa2   : > { %v1428_v18 = vpop.xlane.xlu1 %1427 }
 0xaa3   : > { %v1429_v19 = vmul.f32 0.03125, %v1428_v18 }
 0xaa5   : > { %v1430_v20 = vsub.f32 %v1425_v16, %v1429_v19 }
 0xaa7   : > { %v1431_v21 = vmul.f32 %v1430_v20, %v1430_v20 }
 0xaa9   : > { %v1432_v22 = vsel %vm392_vm1, %v1431_v21, 0.0 }
 0xaaa   : > { %1433 = vadd.xlane.f32.xlu1 %v1432_v22 }
 0xb37   : > { %v1434_v23 = vpop.xlane.xlu1 %1433 }
 0xb38   : > { %v1435_v24 = vmul.f32 0.03125, %v1434_v23 }
 0xb3a   : > { %v1436_v25 = vadd.f32 1e-12, %v1435_v24 }
 0xb3c   : > { %1901 = vrsqrt.f32 %v1436_v25 }
 0xb46   : > { %v1902_v31 = vpop.eup %1901 }
 0xb47   : > { %v1438_v32 = vmul.f32 %v1902_v31, %v1430_v20 }
 0xb49   : > { %v1443_v34 = vmul.f32 %v1442_v29, %v1438_v32 }
 0xb4b   : > { %v1448_v35 = vadd.f32 %v1447_v33, %v1443_v34 }
 0xb4d   : > { %v1449_v36 = vadd.f32 %v1448_v35, %v1248_v56 }
 0xb4f   : > { %v1450_v1 = vsel %vm392_vm1, %v1449_v36, 0.0 }
 0xb50   : > { %1451 = vadd.xlane.f32.xlu1 %v1450_v1 }
 0xbdd   : > { %v1452_v37 = vpop.xlane.xlu1 %1451 }
 0xbde   : > { %v1453_v38 = vmul.f32 0.03125, %v1452_v37 }
 0xbe0   : > { %v1454_v39 = vsub.f32 %v1449_v36, %v1453_v38 }
 0xbe2   : > { %v1455_v40 = vmul.f32 %v1454_v39, %v1454_v39 }
 0xbe4   : > { %v1456_v41 = vsel %vm392_vm1, %v1455_v40, 0.0 }
 0xbe5   : > { %1457 = vadd.xlane.f32.xlu1 %v1456_v41 }
 0xc72   : > { %v1458_v42 = vpop.xlane.xlu1 %1457 }
 0xc73   : > { %v1459_v43 = vmul.f32 0.03125, %v1458_v42 }
 0xc75   : > { %v1460_v44 = vadd.f32 1e-05, %v1459_v43 }
 0xc77   : > { %1903 = vrsqrt.f32 %v1460_v44 }
 0xc81   : > { %v1904_v47 = vpop.eup %1903 }
 0xc82   : > { %v1462_v48 = vmul.f32 %v1904_v47, %v1454_v39 }
 0xc84   : > { %v1467_v50 = vmul.f32 %v1466_v8, %v1462_v48 }
 0xc86   : > { %v1472_v51 = vadd.f32 %v1471_v49, %v1467_v50 }
 0xc88   : > { %1473 = vst.msk [vmem:[%s378_s15] sm:$0xff] %vm392_vm1, %v1472_v51 }
 0xc89   : > { %2060 = shalt.err (!%p2057_p0)
}
 0xc8a   : > { %s2061_s1 = scalar_lea.hbm %s2562_s16, 128  ;;  %s2065_s9 = scalar_lea.hbm %s2615_s8, 256 }
 0xc8b   : > { %p2062_p2 = scmp.ne.s32.totalorder %s2562_s16, %s2061_s1  ;;  %p2066_p10 = scmp.lt.u32.totalorder %s2562_s16, %s2615_s8 }
 0xc8c   : > { %p2067_p11 = scmp.lt.u32.totalorder %s2065_s9, %s2061_s1  ;;  %p2069_p6 = scmp.lt.u32.totalorder %s2061_s1, %s2562_s16 }
 0xc8d   : > { %p2063_p8 = pnand %p2062_p2, %p2635_p5 }
 0xc8e   : > { %p2068_p1 = por %p2067_p11, %p2066_p10 }
 0xc8f   : > { %p2064_p4 = pneg %p2063_p8 }
 0xc90   : > { %p2070_p7 = por %p2069_p6, %p2068_p1 }
 0xc92   : > { %p2071_p9 = pnand %p2070_p7, %p2064_p4 }
 0xc94   : > { %2074 = shalt.err (!%p2071_p9)
}
 0xc95   : > { %1797 = dma.vmem_to_hbm [thread:$0]  (%p2635_p5), %s2564_s18, 128, %s2562_s16, %s1475_s25  }
 0xc96 PF: > { %s1500_s20 = sand.u32 1, %s2109_s27   ;;  %p2636_p12 = scmp.ne.s32.totalorder %s2628_s24, 0 }
 0xc97   : > { %p2637_p3 = scmp.ge.s32.totalorder %s2121_s30, 2  ;;  %s1501_s13 = scalar_lea.sflag [#allocation4], %s1500_s20 }
 0xc99   : > { %p1817_p13 = pnand %p2637_p3, %p2636_p12 }
 0xc9b   : > { %2104 = dma.done.wait (!%p1817_p13), %s1501_s13, 128  }
 0xc9c   : > { %2106 = vsyncadd (!%p1817_p13), %s1501_s13, 4294967168  ;;  %p23_p0 = scmp.ge.s32.totalorder %s2339_s23, 4   ;;  %s2638_s27 = smov %s2113_s28 }
 0xc9d   : > { %s2639_s28 = smov %s2117_s29  ;;  %s2640_s29 = smov %s2350_s21 }
 0xc9e   : > { %s2641_s30 = smov %s2339_s23  ;;  %25 = sbr.rel (!%p23_p0) target bundleno = 9 (0x9), region = 113 }
 0xca5   :  { %1506 = vsyncpa [#allocation3], 1 }
 0xca6   :  { %1508 = vsyncpa [#allocation3 + $0x1], 1 }
 0xca7   :  { %1509 = vsyncpa [#allocation6], 1 }
 0xca8   :  { %1510 = vsyncpa [#allocation9], 1 }
 0xca9   :  { %1511 = vsyncpa [#allocation4], 1 }
 0xcaa   :  { %1513 = vsyncpa [#allocation4 + $0x1], 1 }

</bundles_post_ra>
